<compile_context>
chip_gen: v7x
topology: tpu7x:2x2x1
jax: 0.10.0
libtpu: 0.0.40
codegen_flags: <defaults>
</compile_context>

<pallas_src>
import functools

import jax
import jax.numpy as jnp
from jax.experimental import pallas as pl
from jax.experimental.pallas import tpu as pltpu


def _round_up(a, m):
    return (a + m - 1) // m * m


def _choose_tiles(batch, in_features, num_classes):
    """Tile sizes: tb <= 128 (16-aligned for bf16), tk <= 512, tc <= 2048."""
    tb = min(128, _round_up(max(batch, 1), 16))
    bp = _round_up(max(batch, 1), tb)
    dp = _round_up(in_features, 128)
    tk = dp if dp <= 512 else 512
    dp = _round_up(dp, tk)
    cp = _round_up(num_classes, 128)
    tc = cp if cp <= 2048 else 2048
    cp = _round_up(cp, tc)
    return tb, bp, tk, dp, tc, cp


# ------------------------------ Pallas kernels ------------------------------

def linear_kernel(x_ref, w_ref, b_ref, logits_ref, *scratch, single_k):
    """logits tile = x_tile @ W_tile + bias_tile, tiled over (b, c, k)."""
    if single_k:
        logits_ref[...] = (
            jnp.dot(x_ref[...], w_ref[...], preferred_element_type=jnp.float32)
            + b_ref[...]
        ).astype(logits_ref.dtype)
        return

    (acc_ref,) = scratch
    k = pl.program_id(2)
    nk = pl.num_programs(2)

    @pl.when(k == 0)
    def _():
        acc_ref[...] = jnp.zeros(acc_ref.shape, acc_ref.dtype)

    acc_ref[...] += jnp.dot(x_ref[...], w_ref[...],
                            preferred_element_type=jnp.float32)

    @pl.when(k == nk - 1)
    def _():
        logits_ref[...] = (acc_ref[...] + b_ref[...]).astype(logits_ref.dtype)


def fused_linear_ce_kernel(
    x_ref, w_ref, b_ref, tgt_ref,        # inputs
    logits_ref, nll_ref,                  # outputs
    m_ref, l_ref, t_ref, *maybe_acc,      # scratch (acc only when nk > 1)
    num_classes, batch, tb, tc, single_k,
):
    """x @ W + b -> logits tile -> online logsumexp -> per-tile NLL sum."""
    # All program_id/num_programs binds stay at the top level (outside pl.when
    # bodies) so the interpret-mode fallback can discharge them.
    b = pl.program_id(0)
    c = pl.program_id(1)
    k = pl.program_id(2)
    nc = pl.num_programs(1)
    nk = pl.num_programs(2)

    class_start = c * tc
    row_start = b * tb
    is_first = jnp.logical_and(c == 0, k == 0)
    is_last_k = k == nk - 1
    is_last = jnp.logical_and(c == nc - 1, is_last_k)

    if not single_k:
        (acc_ref,) = maybe_acc

        @pl.when(k == 0)
        def _():
            acc_ref[...] = jnp.zeros(acc_ref.shape, acc_ref.dtype)

        acc_ref[...] += jnp.dot(x_ref[...], w_ref[...],
                                preferred_element_type=jnp.float32)

    @pl.when(is_first)
    def _():
        m_ref[...] = jnp.full(m_ref.shape, -jnp.inf, m_ref.dtype)
        l_ref[...] = jnp.zeros(l_ref.shape, l_ref.dtype)
        t_ref[...] = jnp.zeros(t_ref.shape, t_ref.dtype)

    @pl.when(is_last_k)
    def _():
        if single_k:
            logits = jnp.dot(x_ref[...], w_ref[...],
                             preferred_element_type=jnp.float32) + b_ref[...]
        else:
            logits = acc_ref[...] + b_ref[...]              # (tb, tc) f32
        logits_ref[...] = logits.astype(logits_ref.dtype)

        cls = class_start + jax.lax.broadcasted_iota(jnp.int32, (tb, tc), 1)
        masked = jnp.where(cls < num_classes, logits, -jnp.inf)

        # Online logsumexp update across class tiles.
        m_new = jnp.maximum(m_ref[...],
                            jnp.max(masked, axis=-1, keepdims=True))
        l_ref[...] = (jnp.exp(m_ref[...] - m_new) * l_ref[...]
                      + jnp.sum(jnp.exp(masked - m_new), axis=-1,
                                keepdims=True))
        m_ref[...] = m_new

        # Target logit gathered via one-hot compare (no dynamic gather).
        tgt = tgt_ref[...]                                  # (tb, 1) int32
        t_ref[...] += jnp.sum(jnp.where(cls == tgt, logits, 0.0),
                              axis=-1, keepdims=True)

    @pl.when(is_last)
    def _():
        nll = (m_ref[...] + jnp.log(l_ref[...])) - t_ref[...]   # (tb, 1)
        rows = row_start + jax.lax.broadcasted_iota(jnp.int32, (tb, 1), 0)
        nll = jnp.where(rows < batch, nll, 0.0)                  # mask pad rows
        partial = jnp.sum(nll, axis=0, keepdims=True)            # (1, 1)
        # Lane-dense (1, 8, 128) partial-sum block for this batch tile.
        nll_ref[...] = jnp.broadcast_to(partial[None], nll_ref.shape)


# --------------------------------- wrapper -----------------------------------

def pallas_forward(x, w_padded, b_padded, *, num_classes, tk, tc,
                   targets=None, logits_dtype=jnp.float32):
    """Returns (logits[B, C], loss-or-None) using one fused pallas_call."""
    B, D = x.shape
    Dp, Cp = w_padded.shape
    tb = min(128, _round_up(max(B, 1), 16))
    Bp = _round_up(B, tb)
    nb, nc, nk = Bp // tb, Cp // tc, Dp // tk
    single_k = nk == 1

    x_bf = x.astype(jnp.bfloat16)
    if (Bp, Dp) != (B, D):
        x_p = jnp.zeros((Bp, Dp), jnp.bfloat16).at[:B, :D].set(x_bf)
    else:
        x_p = x_bf

    x_spec = pl.BlockSpec((tb, tk), lambda b, c, k: (b, k))
    w_spec = pl.BlockSpec((tk, tc), lambda b, c, k: (k, c))
    b_spec = pl.BlockSpec((1, tc), lambda b, c, k: (0, c))
    logits_spec = pl.BlockSpec((tb, tc), lambda b, c, k: (b, c))

    itemsize = jnp.dtype(logits_dtype).itemsize
    # Per-step VMEM footprint (double-buffered ins/outs + scratch) + headroom.
    est = (2 * tb * tk * 2 + 2 * tk * tc * 2 + 2 * 8 * tc * 4
           + 2 * tb * tc * itemsize + tb * tc * 4 + 4 * tb * 128 * 4
           + 2 * 8 * 128 * 4)
    vmem_limit = int(min(56 * 1024 * 1024, max(32 * 1024 * 1024, 2 * est)))

    w_bytes = Dp * Cp * 2
    x_bytes = Bp * Dp * 2
    w_reads = 1 if (nc == 1 and nk == 1) else nb   # W re-streamed per b tile
    x_reads = 1 if nk == 1 else nc                 # x re-streamed per c tile
    flops = 2 * Bp * Dp * Cp

    if targets is None:
        cost = pl.CostEstimate(
            flops=flops, transcendentals=0,
            bytes_accessed=(w_reads * w_bytes + x_reads * x_bytes
                            + Bp * Cp * itemsize + 8 * Cp * 4))
        kernel = functools.partial(linear_kernel, single_k=single_k)
        scratch = [] if single_k else [pltpu.VMEM((tb, tc), jnp.float32)]
        logits_p = pl.pallas_call(
            kernel,
            out_shape=jax.ShapeDtypeStruct((Bp, Cp), logits_dtype),
            grid_spec=pltpu.PrefetchScalarGridSpec(
                num_scalar_prefetch=0,
                grid=(nb, nc, nk),
                in_specs=[x_spec, w_spec, b_spec],
                out_specs=logits_spec,
                scratch_shapes=scratch,
            ),
            compiler_params=pltpu.CompilerParams(
                dimension_semantics=("parallel", "parallel", "arbitrary"),
                vmem_limit_bytes=vmem_limit),
            cost_estimate=cost,
        )(x_p, w_padded, b_padded)
        return logits_p[:B, :num_classes], None

    tgt_p = jnp.zeros((Bp, 1), jnp.int32).at[:B, 0].set(
        targets.astype(jnp.int32))
    tgt_spec = pl.BlockSpec((tb, 1), lambda b, c, k: (b, 0))
    nll_spec = pl.BlockSpec((1, 8, 128), lambda b, c, k: (b, 0, 0))

    kernel = functools.partial(
        fused_linear_ce_kernel, num_classes=num_classes, batch=B,
        tb=tb, tc=tc, single_k=single_k)
    scratch = [pltpu.VMEM((tb, 1), jnp.float32) for _ in range(3)]
    if not single_k:
        scratch.append(pltpu.VMEM((tb, tc), jnp.float32))

    cost = pl.CostEstimate(
        flops=flops, transcendentals=Bp * Cp,
        bytes_accessed=(w_reads * w_bytes + x_reads * x_bytes
                        + Bp * Cp * itemsize + 8 * Cp * 4
                        + Bp * 4 + nb * 8 * 128 * 4))

    logits_p, nll_p = pl.pallas_call(
        kernel,
        out_shape=(
            jax.ShapeDtypeStruct((Bp, Cp), logits_dtype),
            jax.ShapeDtypeStruct((nb, 8, 128), jnp.float32),
        ),
        grid_spec=pltpu.PrefetchScalarGridSpec(
            num_scalar_prefetch=0,
            grid=(nb, nc, nk),
            in_specs=[x_spec, w_spec, b_spec, tgt_spec],
            out_specs=(logits_spec, nll_spec),
            scratch_shapes=scratch,
        ),
        compiler_params=pltpu.CompilerParams(
            dimension_semantics=("parallel", "arbitrary", "arbitrary"),
            vmem_limit_bytes=vmem_limit),
        cost_estimate=cost,
    )(x_p, w_padded, b_padded, tgt_p)

    loss = jnp.sum(nll_p[:, 0, 0]) / B          # mean NLL finalized outside
    return logits_p[:B, :num_classes], loss


class PallasModel:
    """JAX/Pallas port of the PyTorch base `Model` with a linear `_model`."""

    _name = "DefaultModel"

    def __init__(self, in_features, num_classes, key):
        kw, kb = jax.random.split(key)
        scale = 1.0 / jnp.sqrt(jnp.float32(in_features))
        self.w = (jax.random.normal(kw, (in_features, num_classes),
                                    jnp.float32) * scale)
        self.b = (jax.random.normal(kb, (1, num_classes), jnp.float32) * scale)
        self.in_features = int(in_features)
        self.num_classes = int(num_classes)

        # Weight padding + bf16 cast hoisted out of the forward pass.
        _, _, tk, Dp, tc, Cp = _choose_tiles(1, in_features, num_classes)
        self._tk, self._tc = tk, tc
        self.w_padded = (jnp.zeros((Dp, Cp), jnp.bfloat16)
                         .at[:in_features, :num_classes]
                         .set(self.w.astype(jnp.bfloat16)))
        self.b_padded = (jnp.zeros((1, Cp), jnp.float32)
                         .at[:, :num_classes].set(self.b))

    def forward(self, x, targets=None):
        # Mirrors: `if targets.size() == torch.Size([0]): return (x, None)`
        if targets is not None and targets.size == 0:
            targets = None
        return pallas_forward(
            x, self.w_padded, self.b_padded,
            num_classes=self.num_classes, tk=self._tk, tc=self._tc,
            targets=targets)

    @property
    def name(self):
        return self._name

    @property
    def learnable_parameters(self):
        return int(self.w.size + self.b.size)


# ----------------------------------- main ------------------------------------

if __name__ == "__main__":
    key = jax.random.PRNGKey(0)
    k_x, k_t, k_p = jax.random.split(key, 3)

    B, D, C = 8, 32, 16
    x = jax.random.normal(k_x, (B, D), jnp.float32)
    targets = jax.random.randint(k_t, (B,), 0, C, dtype=jnp.int32)

    model = PallasModel(D, C, k_p)

    # Path 1: empty targets -> (logits, None)
    logits_only, none_loss = model.forward(x, targets=jnp.array([], jnp.int32))
    jax.block_until_ready(logits_only)
    assert none_loss is None

    # Path 2: with targets -> (logits, loss)
    logits, loss = model.forward(x, targets)
    jax.block_until_ready((logits, loss))

    # Reference on the same bf16-quantized operands the MXU consumes.
    xb = x.astype(jnp.bfloat16).astype(jnp.float32)
    wb = model.w.astype(jnp.bfloat16).astype(jnp.float32)
    ref_logits = jnp.dot(xb, wb, precision=jax.lax.Precision.HIGHEST) + model.b
    ref_nll = (jax.nn.logsumexp(ref_logits, axis=-1)
               - jnp.take_along_axis(ref_logits, targets[:, None], axis=-1)[:, 0])
    ref_loss = jnp.mean(ref_nll)

    assert logits_only.shape == (B, C) and logits.shape == (B, C)
    assert jnp.allclose(logits_only, ref_logits, atol=5e-3, rtol=5e-3)
    assert jnp.allclose(logits, ref_logits, atol=5e-3, rtol=5e-3)
    assert jnp.allclose(loss, ref_loss, atol=5e-3, rtol=5e-3)

    print("KERNEL_OK")
</pallas_src>

<mosaic_0001>
module attributes {stable_mosaic.version = 11 : i64} {
  func.func @linear_kernel(%arg0: i32, %arg1: i32, %arg2: i32, %arg3: memref<16x128xbf16, #tpu.memory_space<vmem>>, %arg4: memref<128x128xbf16, #tpu.memory_space<vmem>>, %arg5: memref<1x128xf32, #tpu.memory_space<vmem>>, %arg6: memref<16x128xf32, #tpu.memory_space<vmem>>) attributes {dimension_semantics = [#tpu.dimension_semantics<parallel>, #tpu.dimension_semantics<parallel>, #tpu.dimension_semantics<arbitrary>], iteration_bounds = array<i64: 1, 1, 1>, scalar_prefetch = 0 : i64, scratch_operands = 0 : i64, tpu.core_type = #tpu.core_type<tc>, window_params = [{transform_indices = @transform_0, window_bounds = array<i64: 16, 128>}, {transform_indices = @transform_1, window_bounds = array<i64: 128, 128>}, {transform_indices = @transform_2, window_bounds = array<i64: 1, 128>}, {transform_indices = @transform_3, window_bounds = array<i64: 16, 128>}]} {
    %c0 = arith.constant 0 : index
    %c0_0 = arith.constant 0 : index
    %0 = vector.load %arg3[%c0, %c0_0] : memref<16x128xbf16, #tpu.memory_space<vmem>>, vector<16x128xbf16>
    %c0_1 = arith.constant 0 : index
    %c0_2 = arith.constant 0 : index
    %1 = vector.load %arg4[%c0_1, %c0_2] : memref<128x128xbf16, #tpu.memory_space<vmem>>, vector<128x128xbf16>
    %cst = arith.constant dense<0.000000e+00> : vector<16x128xf32>
    %2 = tpu.matmul %0, %1, %cst {dimension_numbers = #tpu.dot_dimension_numbers<[1], [0], [0], [1], [0, 0, 1, 1], [], []>} : vector<16x128xbf16>, vector<128x128xbf16>, vector<16x128xf32> -> vector<16x128xf32>
    %c0_3 = arith.constant 0 : index
    %c0_4 = arith.constant 0 : index
    %3 = vector.load %arg5[%c0_3, %c0_4] : memref<1x128xf32, #tpu.memory_space<vmem>>, vector<1x128xf32>
    %4 = vector.broadcast %3 : vector<1x128xf32> to vector<16x128xf32>
    %5 = arith.addf %2, %4 : vector<16x128xf32>
    %c0_5 = arith.constant 0 : index
    %c0_6 = arith.constant 0 : index
    %6 = vector.load %arg6[%c0_5, %c0_6] : memref<16x128xf32, #tpu.memory_space<vmem>>, vector<16x128xf32>
    tpu.vector_store %arg6[%c0_5, %c0_6], %5 {strides = array<i32>} : memref<16x128xf32, #tpu.memory_space<vmem>>, vector<16x128xf32>,
    return
  }
  func.func @transform_0(%arg0: i32, %arg1: i32, %arg2: i32) -> (i32, i32) {
    %c0_i32 = arith.constant 0 : i32
    return %arg0, %arg2 : i32, i32
  }
  func.func @transform_1(%arg0: i32, %arg1: i32, %arg2: i32) -> (i32, i32) {
    %c0_i32 = arith.constant 0 : i32
    return %arg2, %arg1 : i32, i32
  }
  func.func @transform_2(%arg0: i32, %arg1: i32, %arg2: i32) -> (i32, i32) {
    %c0_i32 = arith.constant 0 : i32
    %c0_i32_0 = arith.constant 0 : i32
    return %c0_i32, %arg1 : i32, i32
  }
  func.func @transform_3(%arg0: i32, %arg1: i32, %arg2: i32) -> (i32, i32) {
    %c0_i32 = arith.constant 0 : i32
    return %arg0, %arg1 : i32, i32
  }
}

</mosaic_0001>

<bundles_post_ra>
// kernel: tpu_custom_call.1
= control target key start
LH: loop header
LB: loop body
LE: loop exit
PB: predicated region body
PF: predicated region fallthrough
CT: control target
= control target key end

     0   :  { %8 = vsyncpa [#allocation3], 0  ;;  %s381_s0 = inlined_call_operand.hbm [shape: bf16[16,128], index: 0, kind: input, shape index: {}]   ;;  %s382_s1 = inlined_call_operand.hbm [shape: bf16[128,128], index: 1, kind: input, shape index: {}]   ;;  %s383_s2 = inlined_call_operand.vmem [shape: f32[1,128], index: 2, kind: input, shape index: {}]   ;;  %s384_s3 = inlined_call_operand.hbm [shape: f32[16,128], index: 3, kind: output, shape index: {}]  }
   0x1   :  { %9 = vsyncpa [#allocation6], 0 }
   0x2   :  { %10 = vsyncpa [#allocation4], 0  ;;  %s313_s12 = smov [#allocation2]   ;;  %s241_s16 = scalar_lea.hbm %s381_s0, 128 }
   0x3   :  { %s16_s13 = sshll.u32 %s313_s12, 4  ;;  %p242_p0 = scmp.ne.s32.totalorder %s381_s0, %s241_s16  ;;  %s17_s13 = int_to_ptr.vmem [resolvable:$true] %s16_s13 }
   0x4   :  { %p245_p1 = scmp.lt.u32.totalorder %s241_s16, %s381_s0 }
   0x6   :  { %p247_p2 = pnand %p245_p1, %p242_p0 }
   0x8   :  { %250 = shalt.err (!%p247_p2)
}
   0x9   :  { %s251_s21 = scalar_lea.vmem %s17_s13, 128  ;;  %p256_p4 = scmp.lt.s32.totalorder %s17_s13, %s17_s13 }
   0xa   :  { %p252_p3 = scmp.ne.s32.totalorder %s17_s13, %s251_s21  ;;  %p257_p5 = scmp.lt.s32.totalorder %s251_s21, %s251_s21 }
   0xc   :  { %p258_p6 = por %p257_p5, %p256_p4 }
   0xe   :  { %p259_p7 = pnand %p258_p6, %p252_p3 }
  0x10   :  { %262 = shalt.err (!%p259_p7)
}
  0x11   :  { %s314_s22 = smov 64   ;;  %s315_s23 = smov 4  }
  0x12   :  { %22 = dma.hbm_to_vmem [thread:$0]  %s381_s0, 128, %s17_s13, [#allocation3], %s314_s22, %s314_s22, %s315_s23  }
  0x13   :  { %s316_s26 = smov [#allocation5]   ;;  %s263_s30 = scalar_lea.hbm %s382_s1, 1024 }
  0x14   :  { %s28_s27 = sshll.u32 %s316_s26, 4  ;;  %p264_p8 = scmp.ne.s32.totalorder %s382_s1, %s263_s30  ;;  %s29_s27 = int_to_ptr.vmem [resolvable:$true] %s28_s27 }
  0x15   :  { %p267_p9 = scmp.lt.u32.totalorder %s263_s30, %s382_s1 }
  0x17   :  { %p269_p10 = pnand %p267_p9, %p264_p8 }
  0x19   :  { %272 = shalt.err (!%p269_p10)
}
  0x1a   :  { %s273_s8 = scalar_lea.vmem %s29_s27, 1024  ;;  %p278_p12 = scmp.lt.s32.totalorder %s29_s27, %s29_s27 }
  0x1b   :  { %p274_p11 = scmp.ne.s32.totalorder %s29_s27, %s273_s8  ;;  %p279_p13 = scmp.lt.s32.totalorder %s273_s8, %s273_s8 }
  0x1d   :  { %p280_p0 = por %p279_p13, %p278_p12 }
  0x1f   :  { %p281_p1 = pnand %p280_p0, %p274_p11 }
  0x21   :  { %284 = shalt.err (!%p281_p1)
}
  0x22   :  { %34 = dma.hbm_to_vmem [thread:$0]  %s382_s1, 1024, %s29_s27, [#allocation6], %s314_s22, %s314_s22, %s315_s23  }
  0x23   :  { %307 = dma.done.wait [#allocation3], 128  }
  0x24   :  { %308 = vsyncadd [#allocation3], 4294967168 }
  0x25   :  { %309 = dma.done.wait [#allocation6], 1024  }
  0x26   :  { %310 = vsyncadd [#allocation6], 4294966272  ;;  %v317_v0 = vmov 0.0   ;;  %vm318_vm0 = vmmov 0   ;;  %v232_v1 = vld [vmem:[#allocation5] sm:$0xff]   ;;  %v233_v2 = vld [vmem:[#allocation5 + $0x8] sm:$0xff]  }
  0x27   :  { %203 = vmatprep.subr.bf16.mxu0 %v317_v0  ;;  %219 = vmatprep.mubr.msk.bf16.mxu0 %vm318_vm0, %v317_v0  ;;  %v234_v3 = vld [vmem:[#allocation5 + $0x10] sm:$0xff]   ;;  %v235_v4 = vld [vmem:[#allocation5 + $0x18] sm:$0xff]   ;;  %v236_v5 = vld [vmem:[#allocation5 + $0x20] sm:$0xff]   ;;  %s319_s11 = smov [#allocation7]  }
  0x28   :  { %204 = vmatpush3.bf16.msra.mxu0 %v232_v1  ;;  %v237_v6 = vld [vmem:[#allocation5 + $0x28] sm:$0xff]   ;;  %v238_v7 = vld [vmem:[#allocation5 + $0x30] sm:$0xff]   ;;  %v239_v8 = vld [vmem:[#allocation5 + $0x38] sm:$0xff]   ;;  %s171_s12 = sshll.u32 %s319_s11, 4  ;;  %s172_s12 = int_to_ptr.vmem [resolvable:$true] %s171_s12 }
  0x29   :  { %205 = vmatprep.subr.bf16.mxu0 %v317_v0  ;;  %v240_v9 = vld [vmem:[#allocation2] sm:$0xff]   ;;  %s285_s13 = scalar_lea.vmem %s172_s12, 256  ;;  %p290_p3 = scmp.lt.s32.totalorder %s172_s12, %s172_s12 }
  0x2a   :  { %v184_v10 = vld [vmem:[%s383_s2] ss:$0 sm:$0xff]  ;;  %p286_p2 = scmp.ne.s32.totalorder %s172_s12, %s285_s13  ;;  %p291_p4 = scmp.lt.s32.totalorder %s285_s13, %s285_s13 }
  0x2c   :  { %206 = vmatpush3.bf16.msra.mxu0 %v233_v2  ;;  %p292_p5 = por %p291_p4, %p290_p3 }
  0x2d   :  { %207 = vmatprep.subr.bf16.mxu0 %v317_v0 }
  0x2e   :  { %p293_p6 = pnand %p292_p5, %p286_p2 }
  0x30   :  { %208 = vmatpush3.bf16.msra.mxu0 %v234_v3 }
  0x31   :  { %209 = vmatprep.subr.bf16.mxu0 %v317_v0 }
  0x34   :  { %210 = vmatpush3.bf16.msra.mxu0 %v235_v4 }
  0x35   :  { %211 = vmatprep.subr.bf16.mxu0 %v317_v0 }
  0x38   :  { %212 = vmatpush3.bf16.msra.mxu0 %v236_v5 }
  0x39   :  { %213 = vmatprep.subr.bf16.mxu0 %v317_v0 }
  0x3c   :  { %214 = vmatpush3.bf16.msra.mxu0 %v237_v6 }
  0x3d   :  { %215 = vmatprep.subr.bf16.mxu0 %v317_v0 }
  0x40   :  { %216 = vmatpush3.bf16.msra.mxu0 %v238_v7 }
  0x41   :  { %217 = vmatprep.subr.bf16.mxu0 %v317_v0 }
  0x44   :  { %218 = vmatpush3.bf16.msra.mxu0 %v239_v8 }
  0x47   :  { %220 = vmatmul.mubr.bf16.vlgmr.msra.gmra.mrb[0].mxu0 %v240_v9 }
 0x11a   :  { %v157_v11 = vpop.f32.mrb[0].mxu0 }
 0x11b   :  { %v158_v12 = vadd.f32 %v184_v10, %v157_v11  ;;  %v221_v13 = vpop.f32.mrb[1].mxu0 }
 0x11c   :  { %v160_v14 = vpop.f32.mrb[2].mxu0 }
 0x11d   :  { %164 = vst [vmem:[#allocation7] sm:$0xff] %v158_v12  ;;  %v161_v15 = vadd.f32 %v184_v10, %v160_v14  ;;  %v222_v16 = vpop.f32.mrb[3].mxu0 }
 0x11f   :  { %165 = vst [vmem:[#allocation7 + $0x8] sm:$0xff] %v161_v15 }
 0x120   :  { %296 = shalt.err (!%p293_p6)
}
 0x121   :  { %s297_s15 = scalar_lea.hbm %s384_s3, 256 }
 0x122   :  { %p298_p7 = scmp.ne.s32.totalorder %s384_s3, %s297_s15  ;;  %p301_p8 = scmp.lt.u32.totalorder %s297_s15, %s384_s3 }
 0x124   :  { %p303_p9 = pnand %p301_p8, %p298_p7 }
 0x126   :  { %306 = shalt.err (!%p303_p9)
}
 0x127   :  { %s320_s20 = smov 128   ;;  %s321_s21 = smov 8  }
 0x128   :  { %177 = dma.vmem_to_hbm [thread:$0]  %s172_s12, 256, %s384_s3, [#allocation4], %s320_s20, %s320_s20, %s321_s21  }
 0x129   :  { %311 = dma.done.wait [#allocation4], 256  }
 0x12a   :  { %312 = vsyncadd [#allocation4], 4294967040 }
 0x12b   :  { %181 = vsyncpa [#allocation3], 1 }
 0x12c   :  { %182 = vsyncpa [#allocation6], 1 }
 0x12d   :  { %183 = vsyncpa [#allocation4], 1 }

</bundles_post_ra>
